<compile_context>
chip_gen: v7x
topology: tpu7x:2x2x1
jax: 0.10.0
libtpu: 0.0.40
codegen_flags: <defaults>
</compile_context>

<pallas_src>
import functools

import jax
import jax.numpy as jnp
from jax.experimental import pallas as pl
from jax.experimental.pallas import tpu as pltpu


def value_kernel(x_ref, w1_ref, b1_ref, w2_ref, b2_ref, w3_ref, b3_ref, out_ref):
    # x_ref: (TB, NI); w1: (NI, H); w2: (H, H); w3: (1, H) row; b1/b2: (1, H);
    # b3: (1, 1); out: (TB, 1). Matmul inputs use the weight dtype (bf16 or f32);
    # accumulation / bias / tanh / value head stay f32.
    mm_dtype = w1_ref.dtype
    x = x_ref[...].astype(mm_dtype)
    h1 = jnp.tanh(
        jnp.dot(x, w1_ref[...], preferred_element_type=jnp.float32) + b1_ref[...]
    )
    h2 = jnp.tanh(
        jnp.dot(h1.astype(mm_dtype), w2_ref[...], preferred_element_type=jnp.float32)
        + b2_ref[...]
    )
    # Value head: VPU multiply + lane reduce against the W3 row (avoids a wasteful
    # (H,1)-shaped MXU matmul) -> (TB, 1).
    v = jnp.sum(h2 * w3_ref[...], axis=-1, keepdims=True) + b3_ref[...]
    out_ref[...] = v.astype(out_ref.dtype)


@functools.partial(jax.jit, static_argnames=("block_batch", "use_bf16"))
def value_forward(x, params, *, block_batch=2048, use_bf16=True):
    """Value-network forward pass. Returns state values of shape (batch, 1)."""
    batch, num_inputs = x.shape
    hidden = params["w2"].shape[0]

    x = x.astype(jnp.float32)

    # Batch tile: multiple of 8 sublanes, capped at block_batch. If the batch allows
    # it, force at least 2 grid steps so the "parallel" axis can use both v7x TCs.
    batch8 = pl.cdiv(batch, 8) * 8
    tb = min(block_batch, batch8)
    if batch8 >= 16 and pl.cdiv(batch, tb) < 2:
        tb = pl.cdiv(pl.cdiv(batch8, 2), 8) * 8
    grid = (pl.cdiv(batch, tb),)

    mm_dtype = jnp.bfloat16 if use_bf16 else jnp.float32
    w1 = params["w1"].astype(mm_dtype)
    w2 = params["w2"].astype(mm_dtype)
    w3 = params["w3"]                      # (1, hidden) f32 row, VPU path
    b1, b2, b3 = params["b1"], params["b2"], params["b3"]

    # x / out blocks walk the batch; weights & biases use a constant index_map so they
    # are fetched once and stay VMEM-resident across grid steps.
    x_spec = pl.BlockSpec((tb, num_inputs), lambda i: (i, 0))
    w1_spec = pl.BlockSpec((num_inputs, hidden), lambda i: (0, 0))
    w2_spec = pl.BlockSpec((hidden, hidden), lambda i: (0, 0))
    w3_spec = pl.BlockSpec((1, hidden), lambda i: (0, 0))
    b_spec = pl.BlockSpec((1, hidden), lambda i: (0, 0))
    b3_spec = pl.BlockSpec((1, 1), lambda i: (0, 0))
    out_spec = pl.BlockSpec((tb, 1), lambda i: (i, 0))

    itemsize = jnp.dtype(mm_dtype).itemsize
    flops = 2 * batch * (num_inputs * hidden + hidden * hidden + hidden)
    transcendentals = 2 * batch * hidden
    bytes_accessed = (
        4 * batch * num_inputs                          # x in (f32, true width)
        + itemsize * (num_inputs + hidden) * hidden     # w1, w2 (resident)
        + 4 * (3 * hidden + 1)                          # w3 row + biases
        + 4 * batch                                     # out (batch, 1) f32
    )

    out = pl.pallas_call(
        value_kernel,
        out_shape=jax.ShapeDtypeStruct((batch, 1), jnp.float32),
        grid=grid,
        in_specs=[x_spec, w1_spec, b_spec, w2_spec, b_spec, w3_spec, b3_spec],
        out_specs=out_spec,
        compiler_params=pltpu.CompilerParams(
            dimension_semantics=("parallel",),          # batch-axis sharding on v7x
        ),
        cost_estimate=pl.CostEstimate(
            flops=flops,
            transcendentals=transcendentals,
            bytes_accessed=bytes_accessed,
        ),
    )(x, w1, b1, w2, b2, w3, b3)

    return out


def init_value_params(key, num_inputs, hidden=64, num_outputs=1):
    """Deterministic init mimicking nn.Linear defaults (uniform +/- 1/sqrt(fan_in)),
    then value_head.weight *= 0.1, value_head.bias *= 0.0.

    Weights are stored unpadded: w1 (in, h), w2 (h, h) pre-transposed to (in, out);
    w3 is kept as the (1, h) value-head row (PyTorch layout); biases are (1, h)/(1, 1)."""
    assert num_outputs == 1
    k1, k2, k3, k4, k5, k6 = jax.random.split(key, 6)

    def linear_init(kw, kb, fan_in, fan_out):
        bound = 1.0 / jnp.sqrt(jnp.float32(fan_in))
        w = jax.random.uniform(kw, (fan_in, fan_out), jnp.float32, -bound, bound)
        b = jax.random.uniform(kb, (1, fan_out), jnp.float32, -bound, bound)
        return w, b

    w1, b1 = linear_init(k1, k2, num_inputs, hidden)
    w2, b2 = linear_init(k3, k4, hidden, hidden)
    w3, b3 = linear_init(k5, k6, hidden, num_outputs)
    w3 = (w3 * 0.1).T                 # value_head.weight.data.mul_(0.1); store as (1, h)
    b3 = b3 * 0.0                     # value_head.bias.data.mul_(0.0)

    return dict(w1=w1, b1=b1, w2=w2, b2=b2, w3=w3, b3=b3)


def value_forward_ref(x, p):
    """Pure-JAX f32 reference."""
    h1 = jnp.tanh(x @ p["w1"] + p["b1"])
    h2 = jnp.tanh(h1 @ p["w2"] + p["b2"])
    return h2 @ p["w3"].T + p["b3"]


if __name__ == "__main__":
    key = jax.random.PRNGKey(0)
    kp, kx = jax.random.split(key)

    batch, num_inputs = 8, 16
    params = init_value_params(kp, num_inputs)
    x = jax.random.normal(kx, (batch, num_inputs), jnp.float32)
    v_ref = value_forward_ref(x, params)

    # Default path: bf16 matmul inputs (native MXU dtype on all gens), f32 elsewhere.
    v = jax.block_until_ready(value_forward(x, params))
    assert v.shape == (batch, 1)
    assert jnp.allclose(v, v_ref, atol=3e-2, rtol=3e-2)

    # Exact-parity path: pure f32, bit-faithful to the PyTorch module's math.
    v_exact = jax.block_until_ready(value_forward(x, params, use_bf16=False))
    assert jnp.allclose(v_exact, v_ref, atol=1e-5, rtol=1e-5)

    # Multi-step grid with a batch that is not a tile multiple (ragged last tile).
    batch2 = 300
    x2 = jax.random.normal(jax.random.PRNGKey(1), (batch2, num_inputs), jnp.float32)
    v2_ref = value_forward_ref(x2, params)
    v2 = jax.block_until_ready(value_forward(x2, params, block_batch=128))
    assert v2.shape == (batch2, 1)
    assert jnp.allclose(v2, v2_ref, atol=3e-2, rtol=3e-2)
    v2_exact = jax.block_until_ready(value_forward(x2, params, use_bf16=False))
    assert jnp.allclose(v2_exact, v2_ref, atol=1e-5, rtol=1e-5)

    print("KERNEL_OK")
</pallas_src>

<mosaic_0001>
module attributes {stable_mosaic.version = 11 : i64} {
  func.func @value_kernel(%arg0: i32, %arg1: memref<8x16xf32, #tpu.memory_space<vmem>>, %arg2: memref<16x64xbf16, #tpu.memory_space<vmem>>, %arg3: memref<1x64xf32, #tpu.memory_space<vmem>>, %arg4: memref<64x64xbf16, #tpu.memory_space<vmem>>, %arg5: memref<1x64xf32, #tpu.memory_space<vmem>>, %arg6: memref<1x64xf32, #tpu.memory_space<vmem>>, %arg7: memref<1x1xf32, #tpu.memory_space<vmem>>, %arg8: memref<8x1xf32, #tpu.memory_space<vmem>>) attributes {dimension_semantics = [#tpu.dimension_semantics<parallel>], iteration_bounds = array<i64: 1>, scalar_prefetch = 0 : i64, scratch_operands = 0 : i64, tpu.core_type = #tpu.core_type<tc>, window_params = [{transform_indices = @transform_0, window_bounds = array<i64: 8, 16>}, {pipeline_mode = #tpu.pipeline_mode<synchronous>, transform_indices = @transform_1, window_bounds = array<i64: 16, 64>}, {pipeline_mode = #tpu.pipeline_mode<synchronous>, transform_indices = @transform_2, window_bounds = array<i64: 1, 64>}, {pipeline_mode = #tpu.pipeline_mode<synchronous>, transform_indices = @transform_3, window_bounds = array<i64: 64, 64>}, {pipeline_mode = #tpu.pipeline_mode<synchronous>, transform_indices = @transform_4, window_bounds = array<i64: 1, 64>}, {pipeline_mode = #tpu.pipeline_mode<synchronous>, transform_indices = @transform_5, window_bounds = array<i64: 1, 64>}, {pipeline_mode = #tpu.pipeline_mode<synchronous>, transform_indices = @transform_6, window_bounds = array<i64: 1, 1>}, {transform_indices = @transform_7, window_bounds = array<i64: 8, 1>}]} {
    %c0 = arith.constant 0 : index
    %c0_0 = arith.constant 0 : index
    %0 = vector.load %arg1[%c0, %c0_0] : memref<8x16xf32, #tpu.memory_space<vmem>>, vector<8x16xf32>
    %1 = arith.truncf %0 : vector<8x16xf32> to vector<8x16xbf16>
    %c0_1 = arith.constant 0 : index
    %c0_2 = arith.constant 0 : index
    %2 = vector.load %arg2[%c0_1, %c0_2] : memref<16x64xbf16, #tpu.memory_space<vmem>>, vector<16x64xbf16>
    %cst = arith.constant dense<0.000000e+00> : vector<8x64xf32>
    %3 = tpu.matmul %1, %2, %cst {dimension_numbers = #tpu.dot_dimension_numbers<[1], [0], [0], [1], [0, 0, 1, 1], [], []>} : vector<8x16xbf16>, vector<16x64xbf16>, vector<8x64xf32> -> vector<8x64xf32>
    %c0_3 = arith.constant 0 : index
    %c0_4 = arith.constant 0 : index
    %4 = vector.load %arg3[%c0_3, %c0_4] : memref<1x64xf32, #tpu.memory_space<vmem>>, vector<1x64xf32>
    %5 = vector.broadcast %4 : vector<1x64xf32> to vector<8x64xf32>
    %6 = arith.addf %3, %5 : vector<8x64xf32>
    %7 = math.tanh %6 : vector<8x64xf32>
    %8 = arith.truncf %7 : vector<8x64xf32> to vector<8x64xbf16>
    %c0_5 = arith.constant 0 : index
    %c0_6 = arith.constant 0 : index
    %9 = vector.load %arg4[%c0_5, %c0_6] : memref<64x64xbf16, #tpu.memory_space<vmem>>, vector<64x64xbf16>
    %cst_7 = arith.constant dense<0.000000e+00> : vector<8x64xf32>
    %10 = tpu.matmul %8, %9, %cst_7 {dimension_numbers = #tpu.dot_dimension_numbers<[1], [0], [0], [1], [0, 0, 1, 1], [], []>} : vector<8x64xbf16>, vector<64x64xbf16>, vector<8x64xf32> -> vector<8x64xf32>
    %c0_8 = arith.constant 0 : index
    %c0_9 = arith.constant 0 : index
    %11 = vector.load %arg5[%c0_8, %c0_9] : memref<1x64xf32, #tpu.memory_space<vmem>>, vector<1x64xf32>
    %12 = vector.broadcast %11 : vector<1x64xf32> to vector<8x64xf32>
    %13 = arith.addf %10, %12 : vector<8x64xf32>
    %14 = math.tanh %13 : vector<8x64xf32>
    %c0_10 = arith.constant 0 : index
    %c0_11 = arith.constant 0 : index
    %15 = vector.load %arg6[%c0_10, %c0_11] : memref<1x64xf32, #tpu.memory_space<vmem>>, vector<1x64xf32>
    %16 = vector.broadcast %15 : vector<1x64xf32> to vector<8x64xf32>
    %17 = arith.mulf %14, %16 : vector<8x64xf32>
    %cst_12 = arith.constant dense<0.000000e+00> : vector<8xf32>
    %18 = vector.multi_reduction <add>, %17, %cst_12 [1] : vector<8x64xf32> to vector<8xf32>
    %19 = vector.shape_cast %18 : vector<8xf32> to vector<8x1xf32>
    %c0_13 = arith.constant 0 : index
    %c0_14 = arith.constant 0 : index
    %20 = vector.load %arg7[%c0_13, %c0_14] : memref<1x1xf32, #tpu.memory_space<vmem>>, vector<1x1xf32>
    %21 = vector.broadcast %20 : vector<1x1xf32> to vector<8x1xf32>
    %22 = arith.addf %19, %21 : vector<8x1xf32>
    %c0_15 = arith.constant 0 : index
    %c0_16 = arith.constant 0 : index
    %23 = vector.load %arg8[%c0_15, %c0_16] : memref<8x1xf32, #tpu.memory_space<vmem>>, vector<8x1xf32>
    tpu.vector_store %arg8[%c0_15, %c0_16], %22 {strides = array<i32>} : memref<8x1xf32, #tpu.memory_space<vmem>>, vector<8x1xf32>,
    return
  }
  func.func @transform_0(%arg0: i32) -> (i32, i32) {
    %c0_i32 = arith.constant 0 : i32
    %c0_i32_0 = arith.constant 0 : i32
    return %arg0, %c0_i32 : i32, i32
  }
  func.func @transform_1(%arg0: i32) -> (i32, i32) {
    %c0_i32 = arith.constant 0 : i32
    %c0_i32_0 = arith.constant 0 : i32
    %c0_i32_1 = arith.constant 0 : i32
    return %c0_i32, %c0_i32_0 : i32, i32
  }
  func.func @transform_2(%arg0: i32) -> (i32, i32) {
    %c0_i32 = arith.constant 0 : i32
    %c0_i32_0 = arith.constant 0 : i32
    %c0_i32_1 = arith.constant 0 : i32
    return %c0_i32, %c0_i32_0 : i32, i32
  }
  func.func @transform_3(%arg0: i32) -> (i32, i32) {
    %c0_i32 = arith.constant 0 : i32
    %c0_i32_0 = arith.constant 0 : i32
    %c0_i32_1 = arith.constant 0 : i32
    return %c0_i32, %c0_i32_0 : i32, i32
  }
  func.func @transform_4(%arg0: i32) -> (i32, i32) {
    %c0_i32 = arith.constant 0 : i32
    %c0_i32_0 = arith.constant 0 : i32
    %c0_i32_1 = arith.constant 0 : i32
    return %c0_i32, %c0_i32_0 : i32, i32
  }
  func.func @transform_5(%arg0: i32) -> (i32, i32) {
    %c0_i32 = arith.constant 0 : i32
    %c0_i32_0 = arith.constant 0 : i32
    %c0_i32_1 = arith.constant 0 : i32
    return %c0_i32, %c0_i32_0 : i32, i32
  }
  func.func @transform_6(%arg0: i32) -> (i32, i32) {
    %c0_i32 = arith.constant 0 : i32
    %c0_i32_0 = arith.constant 0 : i32
    %c0_i32_1 = arith.constant 0 : i32
    return %c0_i32, %c0_i32_0 : i32, i32
  }
  func.func @transform_7(%arg0: i32) -> (i32, i32) {
    %c0_i32 = arith.constant 0 : i32
    %c0_i32_0 = arith.constant 0 : i32
    return %arg0, %c0_i32 : i32, i32
  }
}

</mosaic_0001>

<bundles_post_ra>
// kernel: value_forward.1
= control target key start
LH: loop header
LB: loop body
LE: loop exit
PB: predicated region body
PF: predicated region fallthrough
CT: control target
= control target key end

     0   :  { %v248_v0 = vmov 0.0   ;;  %vm249_vm0 = vmmov 0   ;;  %vm46_vm1 = vcmask 130048   ;;  %vm131_vm2 = vcmask 523264   ;;  %s325_s1 = inlined_call_operand.vmem [shape: bf16[16,64], index: 1, kind: input, shape index: {}]   ;;  %s326_s0 = inlined_call_operand.vmem [shape: f32[8,16], index: 0, kind: input, shape index: {}]   ;;  %s327_s3 = inlined_call_operand.vmem [shape: bf16[64,64], index: 3, kind: input, shape index: {}]   ;;  %s328_s2 = inlined_call_operand.vmem [shape: f32[1,64], index: 2, kind: input, shape index: {}]   ;;  %s329_s6 = inlined_call_operand.<no memory space> [shape: f32[1,1], index: 6, kind: input, shape index: {}]   ;;  %s330_s4 = inlined_call_operand.vmem [shape: f32[1,64], index: 4, kind: input, shape index: {}]   ;;  %s331_s5 = inlined_call_operand.vmem [shape: f32[1,64], index: 5, kind: input, shape index: {}]   ;;  %s332_s7 = inlined_call_operand.vmem [shape: f32[8,1], index: 7, kind: output, shape index: {}]  }
   0x1   :  { %219 = vmatprep.subr.bf16.mxu0 %v248_v0  ;;  %v239_v1 = vld [vmem:[%s325_s1] sm:$0xff]   ;;  %221 = vmatprep.mubr.msk.bf16.mxu0 %vm249_vm0, %v248_v0  ;;  %v241_v5 = vld [vmem:[%s327_s3 + $0x8] sm:$0xff]   ;;  %v242_v6 = vld [vmem:[%s327_s3 + $0x10] sm:$0xff]   ;;  %v12_v16 = vstv %s329_s6  ;;  %vm195_vm3 = vcmask 7168  }
   0x2   :  { %v29_v2 = vld [vmem:[%s326_s0] sm:$0xff]  ;;  %225 = vmatprep.subr.bf16.mxu1 %v248_v0  ;;  %233 = vmatprep.mubr.msk.bf16.mxu1 %vm249_vm0, %v248_v0  ;;  %v243_v7 = vld [vmem:[%s327_s3 + $0x18] sm:$0xff]   ;;  %13 = vst [vmem:[#allocation2] sm:$0x1] %v12_v16 }
   0x3   :  { %220 = vmatpush3.bf16.msra.mxu0 %v239_v1  ;;  %v30_v3 = vpack.c.bf16 %v29_v2, %v29_v2  ;;  %v240_v4 = vld [vmem:[%s327_s3] sm:$0xff]  }
   0x4   :  { %226 = vmatpush3.bf16.msra.mxu1 %v240_v4  ;;  %v201_v8 = vld [vmem:[%s328_s2] ss:$0 sm:$0xff] }
   0x5   :  { %227 = vmatprep.subr.bf16.mxu1 %v248_v0  ;;  %v204_v17 = vld [vmem:[%s330_s4] ss:$0 sm:$0xff] }
   0x6   :  { %222 = vmatmul.mubr.msk.bf16.vlgmr.msra.gmra.mrb[0].mxu0 %vm46_vm1, %v30_v3  ;;  %v210_v23 = vld [vmem:[%s331_s5] ss:$0 sm:$0xff] }
   0x8   :  { %228 = vmatpush3.bf16.msra.mxu1 %v241_v5 }
   0x9   :  { %229 = vmatprep.subr.bf16.mxu1 %v248_v0  ;;  %v211_v27 = vld [vmem:[#allocation2] ss:$0 sm:$0xff] }
   0xc   :  { %230 = vmatpush3.bf16.msra.mxu1 %v242_v6 }
   0xd   :  { %231 = vmatprep.subr.bf16.mxu1 %v248_v0 }
  0x10   :  { %232 = vmatpush3.bf16.msra.mxu1 %v243_v7 }
  0xd9   :  { %v84_v9 = vpop.f32.mrb[0].mxu0 }
  0xda   :  { %v85_v10 = vadd.f32 %v201_v8, %v84_v9  ;;  %v223_v11 = vpop.f32.mrb[1].mxu0 }
  0xdb   :  { %v87_v12 = vpop.f32.mrb[2].mxu0 }
  0xdc   :  { %244 = vtanh.f32 %v85_v10  ;;  %v224_v13 = vpop.f32.mrb[3].mxu0 }
  0xe6   :  { %v245_v14 = vpop.eup %244 }
  0xe7   :  { %v91_v15 = vpack.c.bf16 %v245_v14, %v245_v14 }
  0xe9   :  { %234 = vmatmul.mubr.msk.bf16.vlgmr.msra.gmra.mrb[0].mxu1 %vm131_vm2, %v91_v15 }
 0x1bc   :  { %v169_v18 = vpop.f32.mrb[0].mxu1 }
 0x1bd   :  { %v170_v19 = vadd.f32 %v204_v17, %v169_v18  ;;  %v235_v20 = vpop.f32.mrb[1].mxu1 }
 0x1be   :  { %v172_v21 = vpop.f32.mrb[2].mxu1 }
 0x1bf   :  { %246 = vtanh.f32 %v170_v19  ;;  %v236_v22 = vpop.f32.mrb[3].mxu1 }
 0x1c9   :  { %v247_v24 = vpop.eup %246 }
 0x1ca   :  { %v183_v25 = vmul.f32 %v247_v24, %v210_v23 }
 0x1cc   :  { %v184_v26 = vsel %vm131_vm2, %v183_v25, 0.0 }
 0x1cd   :  { %185 = vadd.xlane.f32.xlu0 %v184_v26 }
 0x25a   :  { %v186_v28 = vpop.xlane.xlu0 %185 }
 0x25b   :  { %v194_v29 = vadd.f32 %v211_v27, %v186_v28 }
 0x25d   :  { %196 = vst.msk [vmem:[%s332_s7] sm:$0xff] %vm195_vm3, %v194_v29 }

</bundles_post_ra>
